<compile_context>
chip_gen: v7x
topology: tpu7x:2x2x1
jax: 0.10.0
libtpu: 0.0.40
codegen_flags: <defaults>
</compile_context>

<pallas_src>
import jax
import jax.numpy as jnp
from jax import lax
from jax.experimental import pallas as pl
from jax.experimental.pallas import tpu as pltpu


def _cdiv(a, b):
    return -(-a // b)


def _round_up(x, m):
    return _cdiv(x, m) * m


# Tile caps: double-buffered x/W/out tiles at these caps use ~16 MiB of VMEM,
# leaving headroom under the 48 MiB scoped limit (v7x physical VMEM is 64 MiB;
# v5e/v6e have 128 MiB, so this is conservative there too).
_TM_CAP = 512
_TN_CAP = 1024
_TK_CAP = 1024
_VMEM_LIMIT_BYTES = 48 * 1024 * 1024


def _pick_tile(dim, cap, align):
    """Whole dim if it fits the cap (single block, no waste); else balanced blocks."""
    if dim <= cap:
        return dim
    nblocks = _cdiv(dim, cap)
    return min(cap, _round_up(_cdiv(dim, nblocks), align))


def linear_forward(x, weight, bias):
    """Equivalent of nn.Linear forward.

    x:      [B, D_in]      float32
    weight: [D_out, D_in]  (PyTorch layout — NOT transposed anywhere)
    bias:   [D_out]
    returns [B, D_out]
    """
    B, D_in = x.shape
    D_out = weight.shape[0]

    tm = _pick_tile(B, _TM_CAP, 8)        # sublane dim: mult of 8, or == B
    tn = _pick_tile(D_out, _TN_CAP, 128)  # lane dim of out: mult of 128, or == D_out
    tk = _pick_tile(D_in, _TK_CAP, 128)   # lane dim of x/W: mult of 128, or == D_in

    # VMEM budget check: 2x-buffered x, W, bias and (resident) out tiles, f32.
    def _vmem_bytes(tm_, tn_, tk_):
        return 4 * (2 * tm_ * tk_ + 2 * tn_ * tk_ + 2 * tn_ + 2 * tm_ * tn_)

    while _vmem_bytes(tm, tn, tk) > (_VMEM_LIMIT_BYTES * 3) // 4 and tk > 128:
        tk = max(128, _round_up(tk // 2, 128))
    while _vmem_bytes(tm, tn, tk) > (_VMEM_LIMIT_BYTES * 3) // 4 and tn > 128:
        tn = max(128, _round_up(tn // 2, 128))

    gm = _cdiv(B, tm)
    gn = _cdiv(D_out, tn)
    gk = _cdiv(D_in, tk)

    # Only the K axis needs exact handling: garbage in a partial last K block
    # would corrupt every output element. M/N edge-block garbage only reaches
    # out-of-bounds output rows/cols, which Pallas never writes back.
    k_rem = D_in % tk
    needs_k_mask = k_rem != 0

    def kernel(x_ref, w_ref, b_ref, o_ref):
        # x_ref: [tm, tk]   activations
        # w_ref: [tn, tk]   weight in PyTorch [D_out, D_in] layout
        # b_ref: [1, tn]    bias row for this N tile
        # o_ref: [tm, tn]   f32 output block, used directly as the accumulator
        #                   (resident across K: its block index is (i, j) for all k)
        k = pl.program_id(2)
        nk = pl.num_programs(2)

        @pl.when(k == 0)
        def _init():
            o_ref[...] = jnp.zeros_like(o_ref)

        xv = x_ref[...]
        wv = w_ref[...]
        if needs_k_mask:
            # Zero both operands past D_in on the partial last K block so
            # out-of-bounds garbage (possibly NaN) never reaches the reduction.
            valid = jnp.where(k == nk - 1, k_rem, tk).astype(jnp.int32)
            xv = jnp.where(lax.broadcasted_iota(jnp.int32, xv.shape, 1) < valid, xv, 0.0)
            wv = jnp.where(lax.broadcasted_iota(jnp.int32, wv.shape, 1) < valid, wv, 0.0)

        # NT contraction: dim 1 of x (D_in) against dim 1 of W (D_in) -> (tm, tn).
        o_ref[...] += lax.dot_general(
            xv,
            wv,
            dimension_numbers=(((1,), (1,)), ((), ())),
            preferred_element_type=jnp.float32,
        )

        @pl.when(k == nk - 1)
        def _epilogue():
            # Bias added exactly once, in f32, on the resident block just
            # before its final HBM write-back.
            o_ref[...] += b_ref[...].astype(o_ref.dtype)

    bias2d = bias.reshape(1, D_out)

    # Advisory cost estimate accounting for re-reads: x is streamed gn times,
    # W is streamed gm times; output written once.
    cost = pl.CostEstimate(
        flops=2 * B * D_in * D_out,
        transcendentals=0,
        bytes_accessed=4 * (B * D_in * gn + D_out * D_in * gm + D_out * gm + B * D_out),
    )

    return pl.pallas_call(
        kernel,
        out_shape=jax.ShapeDtypeStruct((B, D_out), x.dtype),
        grid_spec=pltpu.PrefetchScalarGridSpec(
            num_scalar_prefetch=0,
            grid=(gm, gn, gk),
            in_specs=[
                pl.BlockSpec((tm, tk), lambda i, j, k: (i, k)),  # x tile
                pl.BlockSpec((tn, tk), lambda i, j, k: (j, k)),  # W tile (PyTorch layout)
                pl.BlockSpec((1, tn), lambda i, j, k: (0, j)),   # bias tile (N only)
            ],
            out_specs=pl.BlockSpec((tm, tn), lambda i, j, k: (i, j)),
        ),
        compiler_params=pltpu.CompilerParams(
            dimension_semantics=("parallel", "parallel", "arbitrary"),
            vmem_limit_bytes=_VMEM_LIMIT_BYTES,
        ),
        cost_estimate=cost,
    )(x, weight, bias2d)


if __name__ == "__main__":
    key = jax.random.PRNGKey(0)

    def run_case(batch, input_dim, output_dim, k):
        kx, kw, kb = jax.random.split(k, 3)
        x = jax.random.normal(kx, (batch, input_dim), dtype=jnp.float32)
        bound = 1.0 / float(input_dim) ** 0.5
        weight = jax.random.uniform(
            kw, (output_dim, input_dim), jnp.float32, -bound, bound
        )
        bias = jax.random.uniform(kb, (output_dim,), jnp.float32, -bound, bound)

        out = linear_forward(x, weight, bias)
        out = jax.block_until_ready(out)

        ref = x @ weight.T + bias
        assert out.shape == (batch, output_dim)
        assert jnp.allclose(out, ref, atol=1e-4, rtol=1e-4), float(
            jnp.max(jnp.abs(out - ref))
        )

    k1, k2, k3 = jax.random.split(key, 3)
    # Small shapes consistent with LinearRegression(input_dim, output_dim).
    run_case(batch=8, input_dim=32, output_dim=16, k=k1)
    # Non-tile-aligned shapes: no padding anywhere; cdiv-grid edge blocks on M/N.
    run_case(batch=10, input_dim=48, output_dim=20, k=k2)
    # D_in above the K tile cap: exercises the multi-step K reduction + in-kernel K-tail mask.
    run_case(batch=16, input_dim=1100, output_dim=24, k=k3)

    print("KERNEL_OK")
</pallas_src>

<mosaic_0001>
module attributes {stable_mosaic.version = 11 : i64} {
  func.func @kernel(%arg0: i32, %arg1: i32, %arg2: i32, %arg3: memref<8x32xf32, #tpu.memory_space<vmem>>, %arg4: memref<16x32xf32, #tpu.memory_space<vmem>>, %arg5: memref<1x16xf32, #tpu.memory_space<vmem>>, %arg6: memref<8x16xf32, #tpu.memory_space<vmem>>) attributes {dimension_semantics = [#tpu.dimension_semantics<parallel>, #tpu.dimension_semantics<parallel>, #tpu.dimension_semantics<arbitrary>], iteration_bounds = array<i64: 1, 1, 1>, scalar_prefetch = 0 : i64, scratch_operands = 0 : i64, tpu.core_type = #tpu.core_type<tc>, window_params = [{transform_indices = @transform_0, window_bounds = array<i64: 8, 32>}, {transform_indices = @transform_1, window_bounds = array<i64: 16, 32>}, {transform_indices = @transform_2, window_bounds = array<i64: 1, 16>}, {transform_indices = @transform_3, window_bounds = array<i64: 8, 16>}]} {
    %c0_i32 = arith.constant 0 : i32
    %0 = arith.cmpi eq, %arg2, %c0_i32 : i32
    %1 = arith.extui %0 : i1 to i32
    %c0_i32_0 = arith.constant 0 : i32
    %2 = arith.cmpi ne, %1, %c0_i32_0 : i32
    scf.if %2 {
      %cst_10 = arith.constant 0.000000e+00 : f32
      %12 = vector.broadcast %cst_10 : f32 to vector<8x16xf32>
      %c0_11 = arith.constant 0 : index
      %c0_12 = arith.constant 0 : index
      %13 = vector.load %arg6[%c0_11, %c0_12] : memref<8x16xf32, #tpu.memory_space<vmem>>, vector<8x16xf32>
      tpu.vector_store %arg6[%c0_11, %c0_12], %12 {strides = array<i32>} : memref<8x16xf32, #tpu.memory_space<vmem>>, vector<8x16xf32>,
    } else {
    }
    %c0 = arith.constant 0 : index
    %c0_1 = arith.constant 0 : index
    %3 = vector.load %arg3[%c0, %c0_1] : memref<8x32xf32, #tpu.memory_space<vmem>>, vector<8x32xf32>
    %c0_2 = arith.constant 0 : index
    %c0_3 = arith.constant 0 : index
    %4 = vector.load %arg4[%c0_2, %c0_3] : memref<16x32xf32, #tpu.memory_space<vmem>>, vector<16x32xf32>
    %c0_4 = arith.constant 0 : index
    %c0_5 = arith.constant 0 : index
    %5 = vector.load %arg6[%c0_4, %c0_5] : memref<8x16xf32, #tpu.memory_space<vmem>>, vector<8x16xf32>
    %cst = arith.constant dense<0.000000e+00> : vector<8x16xf32>
    %6 = tpu.matmul %3, %4, %cst {dimension_numbers = #tpu.dot_dimension_numbers<[1], [1], [0], [0], [0, 0, 1, 0], [], []>} : vector<8x32xf32>, vector<16x32xf32>, vector<8x16xf32> -> vector<8x16xf32>
    %7 = arith.addf %5, %6 : vector<8x16xf32>
    %c0_6 = arith.constant 0 : index
    %c0_7 = arith.constant 0 : index
    %8 = vector.load %arg6[%c0_6, %c0_7] : memref<8x16xf32, #tpu.memory_space<vmem>>, vector<8x16xf32>
    tpu.vector_store %arg6[%c0_6, %c0_7], %7 {strides = array<i32>} : memref<8x16xf32, #tpu.memory_space<vmem>>, vector<8x16xf32>,
    %c0_i32_8 = arith.constant 0 : i32
    %9 = arith.cmpi eq, %arg2, %c0_i32_8 : i32
    %10 = arith.extui %9 : i1 to i32
    %c0_i32_9 = arith.constant 0 : i32
    %11 = arith.cmpi ne, %10, %c0_i32_9 : i32
    scf.if %11 {
      %c0_10 = arith.constant 0 : index
      %c0_11 = arith.constant 0 : index
      %12 = vector.load %arg6[%c0_10, %c0_11] : memref<8x16xf32, #tpu.memory_space<vmem>>, vector<8x16xf32>
      %c0_12 = arith.constant 0 : index
      %c0_13 = arith.constant 0 : index
      %13 = vector.load %arg5[%c0_12, %c0_13] : memref<1x16xf32, #tpu.memory_space<vmem>>, vector<1x16xf32>
      %14 = vector.broadcast %13 : vector<1x16xf32> to vector<8x16xf32>
      %15 = arith.addf %12, %14 : vector<8x16xf32>
      %c0_14 = arith.constant 0 : index
      %c0_15 = arith.constant 0 : index
      %16 = vector.load %arg6[%c0_14, %c0_15] : memref<8x16xf32, #tpu.memory_space<vmem>>, vector<8x16xf32>
      tpu.vector_store %arg6[%c0_14, %c0_15], %15 {strides = array<i32>} : memref<8x16xf32, #tpu.memory_space<vmem>>, vector<8x16xf32>,
    } else {
    }
    return
  }
  func.func @transform_0(%arg0: i32, %arg1: i32, %arg2: i32) -> (i32, i32) {
    %c0_i32 = arith.constant 0 : i32
    return %arg0, %arg2 : i32, i32
  }
  func.func @transform_1(%arg0: i32, %arg1: i32, %arg2: i32) -> (i32, i32) {
    %c0_i32 = arith.constant 0 : i32
    return %arg1, %arg2 : i32, i32
  }
  func.func @transform_2(%arg0: i32, %arg1: i32, %arg2: i32) -> (i32, i32) {
    %c0_i32 = arith.constant 0 : i32
    %c0_i32_0 = arith.constant 0 : i32
    return %c0_i32, %arg1 : i32, i32
  }
  func.func @transform_3(%arg0: i32, %arg1: i32, %arg2: i32) -> (i32, i32) {
    %c0_i32 = arith.constant 0 : i32
    return %arg0, %arg1 : i32, i32
  }
}

</mosaic_0001>

<bundles_post_ra>
// kernel: tpu_custom_call.1
= control target key start
LH: loop header
LB: loop body
LE: loop exit
PB: predicated region body
PF: predicated region fallthrough
CT: control target
= control target key end

     0   :  { %8 = vsyncpa [#allocation3], 0  ;;  %s338_s0 = inlined_call_operand.hbm [shape: f32[8,32], index: 0, kind: input, shape index: {}]   ;;  %s339_s1 = inlined_call_operand.hbm [shape: f32[16,32], index: 1, kind: input, shape index: {}]   ;;  %s340_s2 = inlined_call_operand.vmem [shape: f32[1,16], index: 2, kind: input, shape index: {}]   ;;  %s341_s3 = inlined_call_operand.hbm [shape: f32[8,16], index: 3, kind: output, shape index: {}]  }
   0x1   :  { %9 = vsyncpa [#allocation6], 0 }
   0x2   :  { %10 = vsyncpa [#allocation4], 0  ;;  %s261_s12 = smov [#allocation2]   ;;  %s262_s14 = smov [#allocation5]  }
   0x3   :  { %s17_s13 = sshll.u32 %s261_s12, 4  ;;  %s26_s15 = sshll.u32 %s262_s14, 4  ;;  %s18_s13 = int_to_ptr.vmem [resolvable:$true] %s17_s13  ;;  %s289_s15 = int_to_ptr.vmem [resolvable:$true] %s26_s15 }
   0x4   :  { %s189_s18 = scalar_lea.hbm %s338_s0, 128 }
   0x5   :  { %p190_p0 = scmp.ne.s32.totalorder %s338_s0, %s189_s18  ;;  %p193_p1 = scmp.lt.u32.totalorder %s189_s18, %s338_s0 }
   0x7   :  { %p195_p2 = pnand %p193_p1, %p190_p0 }
   0x9   :  { %198 = shalt.err (!%p195_p2)
}
   0xa   :  { %s199_s23 = scalar_lea.vmem %s18_s13, 128  ;;  %p204_p4 = scmp.lt.s32.totalorder %s18_s13, %s18_s13 }
   0xb   :  { %p200_p3 = scmp.ne.s32.totalorder %s18_s13, %s199_s23  ;;  %p205_p5 = scmp.lt.s32.totalorder %s199_s23, %s199_s23 }
   0xd   :  { %p206_p6 = por %p205_p5, %p204_p4 }
   0xf   :  { %p207_p7 = pnand %p206_p6, %p200_p3 }
  0x11   :  { %210 = shalt.err (!%p207_p7)
}
  0x12   :  { %20 = dma.hbm_to_vmem [thread:$0]  %s338_s0, 128, %s18_s13, [#allocation3]  }
  0x13   :  { %s211_s28 = scalar_lea.hbm %s339_s1, 256 }
  0x14   :  { %p212_p8 = scmp.ne.s32.totalorder %s339_s1, %s211_s28  ;;  %p215_p9 = scmp.lt.u32.totalorder %s211_s28, %s339_s1 }
  0x16   :  { %p217_p10 = pnand %p215_p9, %p212_p8 }
  0x18   :  { %220 = shalt.err (!%p217_p10)
}
  0x19   :  { %s221_s6 = scalar_lea.vmem %s289_s15, 256  ;;  %p226_p12 = scmp.lt.s32.totalorder %s289_s15, %s289_s15 }
  0x1a   :  { %p222_p11 = scmp.ne.s32.totalorder %s289_s15, %s221_s6  ;;  %p227_p13 = scmp.lt.s32.totalorder %s221_s6, %s221_s6 }
  0x1c   :  { %p228_p0 = por %p227_p13, %p226_p12 }
  0x1e   :  { %p229_p1 = pnand %p228_p0, %p222_p11 }
  0x20   :  { %232 = shalt.err (!%p229_p1)
}
  0x21   :  { %s263_s0 = smov 128   ;;  %s264_s7 = smov 8  }
  0x22   :  { %32 = dma.hbm_to_vmem [thread:$0]  %s339_s1, 256, %s289_s15, [#allocation6], %s263_s0, %s263_s0, %s264_s7  }
  0x23   :  { %255 = dma.done.wait [#allocation3], 128  }
  0x24   :  { %256 = vsyncadd [#allocation3], 4294967168 }
  0x25   :  { %257 = dma.done.wait [#allocation6], 256  }
  0x26   :  { %258 = vsyncadd [#allocation6], 4294967040  ;;  %vm45_vm0 = vcmask 130048   ;;  %v265_v0 = vmov 0.0|0.0   ;;  %v266_v1 = vmov 0.0   ;;  %vm267_vm1 = vmmov 0  }
  0x27   :  { %177 = vmatprep.subr.bf16.mxu0 %v265_v0  ;;  %46 = vst.msk [vmem:[#allocation7] sm:$0xff] %vm45_vm0, %v266_v1  ;;  %174 = vmatprep.mubr.msk.f32.mxu0 %vm267_vm1, %v266_v1  ;;  %vm51_vm2 = vcmask 261120   ;;  %v48_v2 = vld [vmem:[#allocation5] sm:$0xff]  ;;  %v49_v3 = vld [vmem:[#allocation5 + $0x8] sm:$0xff]  ;;  %v47_v5 = vld [vmem:[#allocation2] sm:$0xff]  ;;  %s268_s11 = smov [#allocation7]  }
  0x28   :  { %vm179_vm3 = vmpackc.low %vm51_vm2, %vm51_vm2  ;;  %v178_v4 = vpack.c.bf16 %v49_v3, %v48_v2  ;;  %v166_v10 = vld [vmem:[%s340_s2] ss:$0 sm:$0xff]  ;;  %s153_s12 = sshll.u32 %s268_s11, 4  ;;  %s154_s12 = int_to_ptr.vmem [resolvable:$true] %s153_s12 }
  0x29   :  { %s233_s13 = scalar_lea.vmem %s154_s12, 128  ;;  %p238_p3 = scmp.lt.s32.totalorder %s154_s12, %s154_s12 }
  0x2a   :  { %180 = vmatpush3.bf16.xpose.msk.msra.mxu0 %vm179_vm3, %v178_v4  ;;  %p234_p2 = scmp.ne.s32.totalorder %s154_s12, %s233_s13  ;;  %p239_p4 = scmp.lt.s32.totalorder %s233_s13, %s233_s13 }
  0x2c   :  { %p240_p5 = por %p239_p4, %p238_p3 }
  0x2e   :  { %v50_v6 = vld [vmem:[#allocation7] sm:$0xff]  ;;  %p241_p6 = pnand %p240_p5, %p234_p2 }
  0x31   :  { %175 = vmatmul.mubr.msk.f32.vlgmr.msra.gmra.mrb[0].mxu0 %vm51_vm2, %v47_v5 }
 0x104   :  { %v127_v7 = vpop.f32.mrb[0].mxu0 }
 0x105   :  { %v131_v8 = vadd.f32 %v127_v7, %v50_v6  ;;  %v176_v9 = vpop.f32.mrb[1].mxu0 }
 0x107   :  { %133 = vst.msk [vmem:[#allocation7] sm:$0xff] %vm45_vm0, %v131_v8 }
 0x10e   :  { %v137_v11 = vld [vmem:[#allocation7] sm:$0xff] }
 0x10f   :  { %v145_v12 = vadd.f32 %v166_v10, %v137_v11 }
 0x111   :  { %146 = vst.msk [vmem:[#allocation7] sm:$0xff] %vm45_vm0, %v145_v12 }
 0x112   :  { %244 = shalt.err (!%p241_p6)
}
 0x113   :  { %s245_s16 = scalar_lea.hbm %s341_s3, 128 }
 0x114   :  { %p246_p7 = scmp.ne.s32.totalorder %s341_s3, %s245_s16  ;;  %p249_p8 = scmp.lt.u32.totalorder %s245_s16, %s341_s3 }
 0x116   :  { %p251_p9 = pnand %p249_p8, %p246_p7 }
 0x118   :  { %254 = shalt.err (!%p251_p9)
}
 0x119   :  { %156 = dma.vmem_to_hbm [thread:$0]  %s154_s12, 128, %s341_s3, [#allocation4]  }
 0x11a   :  { %259 = dma.done.wait [#allocation4], 128  }
 0x11b   :  { %260 = vsyncadd [#allocation4], 4294967168 }
 0x11c   :  { %160 = vsyncpa [#allocation3], 1 }
 0x11d   :  { %161 = vsyncpa [#allocation6], 1 }
 0x11e   :  { %162 = vsyncpa [#allocation4], 1 }

</bundles_post_ra>
